<compile_context>
chip_gen: v7x
topology: tpu7x:2x2x1
jax: 0.10.0
libtpu: 0.0.40
codegen_flags: <defaults>
</compile_context>

<pallas_src>
import functools

import jax
import jax.numpy as jnp
from jax.experimental import pallas as pl
from jax.experimental.pallas import tpu as pltpu


# ----------------------------------------------------------------------------
# Kernels
# ----------------------------------------------------------------------------
def _binary_prob_kernel(x_ref, w_ref, b_ref, o_ref, *, approx):
    """One batch tile of sigmoid(x @ w_diff + b_diff) -> (tile, 1).

    b_ref is a (1, 1) scalar living in SMEM."""
    z = jnp.dot(x_ref[...], w_ref[...], preferred_element_type=jnp.float32)
    z = z + b_ref[0, 0]
    # sigmoid(z) = 1 / (1 + exp(-z)); reciprocal goes to the EUP slot.
    o_ref[...] = pl.reciprocal(1.0 + jnp.exp(-z), approx=approx).astype(o_ref.dtype)


def _sigmoid_heads_kernel(x_ref, w_ref, b_ref, o_ref, *, approx):
    """One batch tile of sigmoid(x @ W + b) -> (tile, n_heads).  VMEM bias row."""
    z = jnp.dot(x_ref[...], w_ref[...], preferred_element_type=jnp.float32) + b_ref[...]
    o_ref[...] = pl.reciprocal(1.0 + jnp.exp(-z), approx=approx).astype(o_ref.dtype)


def _softmax_probs_kernel(x_ref, w_ref, b_ref, o_ref, *, approx):
    """One batch tile of softmax(x @ W + b, axis=-1) -> (tile, C)."""
    logits = jnp.dot(x_ref[...], w_ref[...],
                     preferred_element_type=jnp.float32) + b_ref[...]
    m = jnp.max(logits, axis=-1, keepdims=True)
    e = jnp.exp(logits - m)
    denom = jnp.sum(e, axis=-1, keepdims=True)
    o_ref[...] = (e * pl.reciprocal(denom, approx=approx)).astype(o_ref.dtype)


# ----------------------------------------------------------------------------
# Tiling / generation helpers
# ----------------------------------------------------------------------------
_LANES = 128
_SUBLANES = 8


def _round_up(n, m):
    return ((n + m - 1) // m) * m


@functools.lru_cache(maxsize=1)
def _device_kind():
    try:
        return jax.devices()[0].device_kind.lower()
    except Exception:  # pragma: no cover - defensive
        return ""


def _vmem_limit_bytes(kind):
    # Generation-aware VMEM budget: v7x has only 64 MiB physical per TC, so
    # keep its limit <= ~48 MiB; v5e/v6e have 128 MiB physical, 64 MiB is safe.
    if "v7" in kind:
        return 48 * 1024 * 1024
    if "v6" in kind or "v5" in kind:
        return 64 * 1024 * 1024
    return 32 * 1024 * 1024


def _pick_batch_tile(batch, d, n_out, in_itemsize, *, vmem_limit, is_v7x,
                     target_x_bytes=4 << 20, min_rows=512):
    """Byte-based batch tile: big enough that the ~0.35 us/step overhead is
    amortised against the x DMA, capped by the double-buffered VMEM budget."""
    # HBM-traffic-based target (what actually has to move per step).
    rows_target = max(min_rows, target_x_bytes // max(1, d * in_itemsize))
    # VMEM cap: 2x (double-buffered) x block + 2x output block, using the
    # lane-padded VMEM footprint (last dim pads to 128 lanes in VMEM).
    row_vmem = (_round_up(d, _LANES) * in_itemsize
                + _round_up(max(n_out, 1), _LANES) * 4)
    rows_vmem = max(_SUBLANES, int(0.6 * vmem_limit) // (2 * row_vmem))
    # Don't exceed the batch (floor to sublane multiple so blocks never exceed
    # the array except for the standard ragged last block).
    cap = max(_SUBLANES, (batch // _SUBLANES) * _SUBLANES)
    tile = min(rows_target, rows_vmem, cap)
    if is_v7x and batch >= 4 * min_rows:
        # v7x has 2 TensorCores sharing the "parallel" batch axis: keep >=4
        # grid steps (>=2 per core) so each core still double-buffers.
        tile = min(tile, max(min_rows, _round_up(pl.cdiv(batch, 4), _SUBLANES)))
    return max(_SUBLANES, (tile // _SUBLANES) * _SUBLANES)


def _mosaic_params(vmem_limit):
    return pltpu.CompilerParams(
        dimension_semantics=("parallel",),
        vmem_limit_bytes=vmem_limit,
    )


def _fit_features(x, input_dim):
    """Original numpy glue: truncate or zero-pad the feature axis to input_dim."""
    feat = x.shape[1]
    if feat > input_dim:
        x = x[:, :input_dim]
    elif feat < input_dim:
        x = jnp.pad(x, ((0, 0), (0, input_dim - feat)))
    return x


# ----------------------------------------------------------------------------
# pallas_call wrappers
# ----------------------------------------------------------------------------
def binary_prob_pallas(x, w_diff, b_diff, *, batch_tile, approx, vmem_limit):
    """sigmoid(x @ w_diff + b_diff) -> (B, 1) float32.  Bias scalar in SMEM."""
    batch, d = x.shape
    grid = (pl.cdiv(batch, batch_tile),)
    kernel = functools.partial(_binary_prob_kernel, approx=approx)
    return pl.pallas_call(
        kernel,
        out_shape=jax.ShapeDtypeStruct((batch, 1), jnp.float32),
        grid=grid,
        in_specs=[
            pl.BlockSpec((batch_tile, d), lambda i: (i, 0)),
            pl.BlockSpec((d, 1), lambda i: (0, 0)),
            pl.BlockSpec(memory_space=pltpu.MemorySpace.SMEM),
        ],
        out_specs=pl.BlockSpec((batch_tile, 1), lambda i: (i, 0)),
        compiler_params=_mosaic_params(vmem_limit),
        cost_estimate=pl.CostEstimate(
            flops=2 * batch * d,
            transcendentals=2 * batch,          # exp + approx reciprocal
            bytes_accessed=int(x.size * x.dtype.itemsize
                               + w_diff.size * 4 + 4 + batch * 4)),
    )(x, w_diff, b_diff)


def sigmoid_heads_pallas(x, w, b, *, batch_tile, approx, vmem_limit):
    """sigmoid(x @ W + b) -> (B, n_heads) float32 (fused stacking heads)."""
    batch, d = x.shape
    m = w.shape[1]
    grid = (pl.cdiv(batch, batch_tile),)
    kernel = functools.partial(_sigmoid_heads_kernel, approx=approx)
    return pl.pallas_call(
        kernel,
        out_shape=jax.ShapeDtypeStruct((batch, m), jnp.float32),
        grid=grid,
        in_specs=[
            pl.BlockSpec((batch_tile, d), lambda i: (i, 0)),
            pl.BlockSpec((d, m), lambda i: (0, 0)),
            pl.BlockSpec((1, m), lambda i: (0, 0)),
        ],
        out_specs=pl.BlockSpec((batch_tile, m), lambda i: (i, 0)),
        compiler_params=_mosaic_params(vmem_limit),
        cost_estimate=pl.CostEstimate(
            flops=2 * batch * d * m,
            transcendentals=2 * batch * m,
            bytes_accessed=int(x.size * x.dtype.itemsize + w.size * 4
                               + b.size * 4 + batch * m * 4)),
    )(x, w, b)


def softmax_probs_pallas(x, w, b, *, batch_tile, approx, vmem_limit):
    """softmax(x @ W + b) -> (B, C) float32."""
    batch, d = x.shape
    n_classes = w.shape[1]
    grid = (pl.cdiv(batch, batch_tile),)
    kernel = functools.partial(_softmax_probs_kernel, approx=approx)
    return pl.pallas_call(
        kernel,
        out_shape=jax.ShapeDtypeStruct((batch, n_classes), jnp.float32),
        grid=grid,
        in_specs=[
            pl.BlockSpec((batch_tile, d), lambda i: (i, 0)),
            pl.BlockSpec((d, n_classes), lambda i: (0, 0)),
            pl.BlockSpec((1, n_classes), lambda i: (0, 0)),
        ],
        out_specs=pl.BlockSpec((batch_tile, n_classes), lambda i: (i, 0)),
        compiler_params=_mosaic_params(vmem_limit),
        cost_estimate=pl.CostEstimate(
            flops=2 * batch * d * n_classes,
            transcendentals=batch * (n_classes + 1),
            bytes_accessed=int(x.size * x.dtype.itemsize + w.size * 4
                               + b.size * 4 + batch * n_classes * 4)),
    )(x, w, b)


# ----------------------------------------------------------------------------
# Module wrapper (forward-pass semantics of BaseModelWrapper)
# ----------------------------------------------------------------------------
class BaseModelWrapperPallas:
    """JAX/Pallas re-implementation of BaseModelWrapper.forward semantics."""

    def __init__(self, model_type, input_dim, output_dim, n_classes=2, seed=0,
                 compute_dtype=jnp.float32, approx_reciprocal=True):
        self.model_type = model_type
        self.input_dim = input_dim
        self.output_dim = output_dim
        self.n_classes = n_classes
        self.compute_dtype = jnp.dtype(compute_dtype)
        self.approx_reciprocal = approx_reciprocal
        self.is_initialized = True  # deterministic synthetic "fitted" model

        # Deterministic synthetic logistic-regression parameters (stand-in for
        # the fitted sklearn model's predict_proba).  Kept f32 and at natural
        # width: no padded weight rows needed any more.
        kw, kb = jax.random.split(jax.random.PRNGKey(seed))
        self.w = jax.random.normal(kw, (input_dim, n_classes), jnp.float32) * 0.1
        self.b = jax.random.normal(kb, (1, n_classes), jnp.float32) * 0.1

        if n_classes == 2:
            # Fold the positive-class slice into the kernel:
            # softmax(z)[:, 1] == sigmoid(z1 - z0).
            self.w_diff = self.w[:, 1:2] - self.w[:, 0:1]   # (D, 1)
            self.b_diff = self.b[:, 1:2] - self.b[:, 0:1]   # (1, 1)

        # Single jitted forward: truncate/pad glue + optional cast + kernel all
        # compile into one XLA program (no eager per-op dispatch).
        self._forward = jax.jit(self._forward_impl)

    # -- jitted hot path ----------------------------------------------------
    def _forward_impl(self, x):
        x = _fit_features(jnp.asarray(x, jnp.float32), self.input_dim)

        # Optional bf16 x path: cast ONLY x (weights stay f32).  Worthwhile
        # only when the cast fuses with an upstream producer of x.
        if self.compute_dtype != jnp.dtype(jnp.float32):
            x = x.astype(self.compute_dtype)

        batch, d = x.shape
        kind = _device_kind()
        vmem_limit = _vmem_limit_bytes(kind)
        n_out = 1 if self.n_classes == 2 else self.n_classes
        tile = _pick_batch_tile(batch, d, n_out, x.dtype.itemsize,
                                vmem_limit=vmem_limit, is_v7x=("v7" in kind))

        if self.n_classes == 2:
            return binary_prob_pallas(x, self.w_diff, self.b_diff,
                                      batch_tile=tile,
                                      approx=self.approx_reciprocal,
                                      vmem_limit=vmem_limit)
        return softmax_probs_pallas(x, self.w, self.b,
                                    batch_tile=tile,
                                    approx=self.approx_reciprocal,
                                    vmem_limit=vmem_limit)

    # -- public API ----------------------------------------------------------
    def forward(self, x):
        x = jnp.asarray(x)
        if not self.is_initialized:
            return jnp.zeros((x.shape[0], self.output_dim), jnp.float32)
        return self._forward(x)

    __call__ = forward


def fused_binary_heads_forward(models, x):
    """Run several fitted binary heads that consume the SAME x as one kernel.

    Concatenates each head's w_diff column into a single (D, n_models) RHS so
    the (HBM-bound) x DMA is amortised across all heads.  Returns (B, n_models)
    where column j is models[j]'s positive-class probability."""
    assert models and all(m.n_classes == 2 for m in models)
    input_dim = models[0].input_dim
    assert all(m.input_dim == input_dim for m in models)

    x = _fit_features(jnp.asarray(x, jnp.float32), input_dim)
    w = jnp.concatenate([m.w_diff for m in models], axis=1)   # (D, M) f32
    b = jnp.concatenate([m.b_diff for m in models], axis=1)   # (1, M) f32

    batch, d = x.shape
    kind = _device_kind()
    vmem_limit = _vmem_limit_bytes(kind)
    tile = _pick_batch_tile(batch, d, w.shape[1], x.dtype.itemsize,
                            vmem_limit=vmem_limit, is_v7x=("v7" in kind))
    return sigmoid_heads_pallas(x, w, b, batch_tile=tile, approx=True,
                                vmem_limit=vmem_limit)


# ----------------------------------------------------------------------------
# Self-test
# ----------------------------------------------------------------------------
if __name__ == "__main__":
    B, D = 8, 32  # batch=8, input_dim=32
    key = jax.random.PRNGKey(0)
    x = jax.random.normal(key, (B, D), jnp.float32)

    # Binary classifier: output is the positive-class column, shape (B, 1).
    m2 = BaseModelWrapperPallas("lr", input_dim=D, output_dim=1,
                                n_classes=2, seed=0)
    out2 = jax.block_until_ready(m2.forward(x))
    ref2 = jax.nn.softmax(x @ m2.w + m2.b, axis=-1)[:, 1:2]
    assert out2.shape == (B, 1), out2.shape
    assert out2.dtype == jnp.float32
    assert jnp.allclose(out2, ref2, atol=5e-3, rtol=5e-3), "binary mismatch"

    # Multi-class classifier with a batch that is NOT a multiple of 8
    # (exercises Pallas edge-block clamping: no wrapper-side batch pad).
    B2 = 13
    x13 = jax.random.normal(jax.random.PRNGKey(2), (B2, D), jnp.float32)
    m4 = BaseModelWrapperPallas("lr", input_dim=D, output_dim=4,
                                n_classes=4, seed=1)
    out4 = jax.block_until_ready(m4.forward(x13))
    ref4 = jax.nn.softmax(x13 @ m4.w + m4.b, axis=-1)
    assert out4.shape == (B2, 4), out4.shape
    assert jnp.allclose(out4, ref4, atol=5e-3, rtol=5e-3), "multiclass mismatch"

    # Dimension-mismatch glue: wider input is truncated to input_dim.
    x_wide = jax.random.normal(jax.random.PRNGKey(1), (B, D + 5), jnp.float32)
    out_t = jax.block_until_ready(m2.forward(x_wide))
    ref_t = jax.nn.softmax(x_wide[:, :D] @ m2.w + m2.b, axis=-1)[:, 1:2]
    assert jnp.allclose(out_t, ref_t, atol=5e-3, rtol=5e-3), "truncate mismatch"

    # Dimension-mismatch glue: narrower input is zero-padded to input_dim.
    x_narrow = jax.random.normal(jax.random.PRNGKey(3), (B, D - 7), jnp.float32)
    out_p = jax.block_until_ready(m2.forward(x_narrow))
    x_np = jnp.pad(x_narrow, ((0, 0), (0, 7)))
    ref_p = jax.nn.softmax(x_np @ m2.w + m2.b, axis=-1)[:, 1:2]
    assert jnp.allclose(out_p, ref_p, atol=5e-3, rtol=5e-3), "pad mismatch"

    # Fused stacking ensemble: two binary heads, one kernel, one x DMA.
    m2b = BaseModelWrapperPallas("svm", input_dim=D, output_dim=1,
                                 n_classes=2, seed=7)
    fused = jax.block_until_ready(fused_binary_heads_forward([m2, m2b], x))
    ref_f = jnp.concatenate(
        [ref2, jax.nn.softmax(x @ m2b.w + m2b.b, axis=-1)[:, 1:2]], axis=1)
    assert fused.shape == (B, 2), fused.shape
    assert jnp.allclose(fused, ref_f, atol=5e-3, rtol=5e-3), "fused mismatch"

    print("KERNEL_OK")
</pallas_src>

<mosaic_0001>
module attributes {stable_mosaic.version = 11 : i64} {
  func.func @_binary_prob_kernel(%arg0: i32, %arg1: memref<8x32xf32, #tpu.memory_space<vmem>>, %arg2: memref<32x1xf32, #tpu.memory_space<vmem>>, %arg3: memref<1x1xf32, #tpu.memory_space<smem>>, %arg4: memref<8x1xf32, #tpu.memory_space<vmem>>) attributes {dimension_semantics = [#tpu.dimension_semantics<parallel>], iteration_bounds = array<i64: 1>, scalar_prefetch = 0 : i64, scratch_operands = 0 : i64, tpu.core_type = #tpu.core_type<tc>, window_params = [{transform_indices = @transform_0, window_bounds = array<i64: 8, 32>}, {pipeline_mode = #tpu.pipeline_mode<synchronous>, transform_indices = @transform_1, window_bounds = array<i64: 32, 1>}, {transform_indices = @transform_2, window_bounds = array<i64: 1, 1>}, {transform_indices = @transform_3, window_bounds = array<i64: 8, 1>}]} {
    %c0 = arith.constant 0 : index
    %c0_0 = arith.constant 0 : index
    %0 = vector.load %arg1[%c0, %c0_0] : memref<8x32xf32, #tpu.memory_space<vmem>>, vector<8x32xf32>
    %c0_1 = arith.constant 0 : index
    %c0_2 = arith.constant 0 : index
    %1 = vector.load %arg2[%c0_1, %c0_2] : memref<32x1xf32, #tpu.memory_space<vmem>>, vector<32x1xf32>
    %cst = arith.constant dense<0.000000e+00> : vector<8x1xf32>
    %2 = tpu.matmul %0, %1, %cst {dimension_numbers = #tpu.dot_dimension_numbers<[1], [0], [0], [1], [0, 0, 1, 1], [], []>} : vector<8x32xf32>, vector<32x1xf32>, vector<8x1xf32> -> vector<8x1xf32>
    %c0_3 = arith.constant 0 : index
    %c0_4 = arith.constant 0 : index
    %3 = memref.load %arg3[%c0_3, %c0_4] : memref<1x1xf32, #tpu.memory_space<smem>>
    %4 = vector.broadcast %3 : f32 to vector<8x1xf32>
    %5 = arith.addf %2, %4 : vector<8x1xf32>
    %cst_5 = arith.constant 0.000000e+00 : f32
    %6 = vector.broadcast %cst_5 : f32 to vector<8x1xf32>
    %7 = arith.subf %6, %5 : vector<8x1xf32>
    %8 = math.exp %7 : vector<8x1xf32>
    %cst_6 = arith.constant 1.000000e+00 : f32
    %9 = vector.broadcast %cst_6 : f32 to vector<8x1xf32>
    %10 = arith.addf %9, %8 : vector<8x1xf32>
    %11 = tpu.reciprocal %10 {approx = true} : vector<8x1xf32> -> vector<8x1xf32>
    %c0_7 = arith.constant 0 : index
    %c0_8 = arith.constant 0 : index
    %12 = vector.load %arg4[%c0_7, %c0_8] : memref<8x1xf32, #tpu.memory_space<vmem>>, vector<8x1xf32>
    tpu.vector_store %arg4[%c0_7, %c0_8], %11 {strides = array<i32>} : memref<8x1xf32, #tpu.memory_space<vmem>>, vector<8x1xf32>,
    return
  }
  func.func @transform_0(%arg0: i32) -> (i32, i32) {
    %c0_i32 = arith.constant 0 : i32
    %c0_i32_0 = arith.constant 0 : i32
    return %arg0, %c0_i32 : i32, i32
  }
  func.func @transform_1(%arg0: i32) -> (i32, i32) {
    %c0_i32 = arith.constant 0 : i32
    %c0_i32_0 = arith.constant 0 : i32
    %c0_i32_1 = arith.constant 0 : i32
    return %c0_i32, %c0_i32_0 : i32, i32
  }
  func.func @transform_2(%arg0: i32) -> (i32, i32) {
    %c0_i32 = arith.constant 0 : i32
    %c0_i32_0 = arith.constant 0 : i32
    %c0_i32_1 = arith.constant 0 : i32
    return %c0_i32, %c0_i32_0 : i32, i32
  }
  func.func @transform_3(%arg0: i32) -> (i32, i32) {
    %c0_i32 = arith.constant 0 : i32
    %c0_i32_0 = arith.constant 0 : i32
    return %arg0, %c0_i32 : i32, i32
  }
}

</mosaic_0001>

<bundles_post_ra>
// kernel: _forward_impl.1
= control target key start
LH: loop header
LB: loop body
LE: loop exit
PB: predicated region body
PF: predicated region fallthrough
CT: control target
= control target key end

     0   :  { %9 = vsyncpa [#allocation4], 0  ;;  %s281_s0 = inlined_call_operand.hbm [shape: f32[8,32], index: 0, kind: input, shape index: {}]   ;;  %s282_s1 = inlined_call_operand.hbm [shape: f32[32,1], index: 1, kind: input, shape index: {}]   ;;  %s283_s2 = inlined_call_operand.<no memory space> [shape: f32[1,1], index: 2, kind: input, shape index: {}]   ;;  %s284_s3 = inlined_call_operand.vmem [shape: f32[8,1], index: 3, kind: output, shape index: {}]  }
   0x1   :  { %10 = vsyncpa [#allocation6], 0  ;;  %s217_s12 = smov [#allocation3]   ;;  %s218_s14 = smov [#allocation5]  }
   0x2   :  { %s17_s13 = sshll.u32 %s217_s12, 4  ;;  %s26_s15 = sshll.u32 %s218_s14, 4  ;;  %s18_s13 = int_to_ptr.vmem [resolvable:$true] %s17_s13  ;;  %s244_s15 = int_to_ptr.vmem [resolvable:$true] %s26_s15 }
   0x3   :  { %s169_s18 = scalar_lea.hbm %s281_s0, 128 }
   0x4   :  { %p170_p0 = scmp.ne.s32.totalorder %s281_s0, %s169_s18  ;;  %p173_p1 = scmp.lt.u32.totalorder %s169_s18, %s281_s0 }
   0x6   :  { %p175_p2 = pnand %p173_p1, %p170_p0 }
   0x8   :  { %178 = shalt.err (!%p175_p2)
}
   0x9   :  { %s179_s23 = scalar_lea.vmem %s18_s13, 128  ;;  %p184_p4 = scmp.lt.s32.totalorder %s18_s13, %s18_s13 }
   0xa   :  { %p180_p3 = scmp.ne.s32.totalorder %s18_s13, %s179_s23  ;;  %p185_p5 = scmp.lt.s32.totalorder %s179_s23, %s179_s23 }
   0xc   :  { %p186_p6 = por %p185_p5, %p184_p4 }
   0xe   :  { %p187_p7 = pnand %p186_p6, %p180_p3 }
  0x10   :  { %190 = shalt.err (!%p187_p7)
}
  0x11   :  { %20 = dma.hbm_to_vmem [thread:$0]  %s281_s0, 128, %s18_s13, [#allocation4]  }
  0x12   :  { %s191_s28 = scalar_lea.hbm %s282_s1, 512 }
  0x13   :  { %p192_p8 = scmp.ne.s32.totalorder %s282_s1, %s191_s28  ;;  %p195_p9 = scmp.lt.u32.totalorder %s191_s28, %s282_s1 }
  0x15   :  { %p197_p10 = pnand %p195_p9, %p192_p8 }
  0x17   :  { %200 = shalt.err (!%p197_p10)
}
  0x18   :  { %s201_s6 = scalar_lea.vmem %s244_s15, 512  ;;  %p206_p12 = scmp.lt.s32.totalorder %s244_s15, %s244_s15 }
  0x19   :  { %p202_p11 = scmp.ne.s32.totalorder %s244_s15, %s201_s6  ;;  %p207_p13 = scmp.lt.s32.totalorder %s201_s6, %s201_s6 }
  0x1b   :  { %p208_p0 = por %p207_p13, %p206_p12 }
  0x1d   :  { %p209_p1 = pnand %p208_p0, %p202_p11 }
  0x1f   :  { %212 = shalt.err (!%p209_p1)
}
  0x20   :  { %s219_s0 = smov 128   ;;  %s220_s7 = smov 8  }
  0x21   :  { %32 = dma.hbm_to_vmem [thread:$0]  %s282_s1, 512, %s244_s15, [#allocation6], %s219_s0, %s219_s0, %s220_s7  }
  0x22   :  { %213 = dma.done.wait [#allocation4], 128  }
  0x23   :  { %214 = vsyncadd [#allocation4], 4294967168 }
  0x24   :  { %215 = dma.done.wait [#allocation6], 512  }
  0x25   :  { %216 = vsyncadd [#allocation6], 4294966784  ;;  %v221_v0 = vmov 0.0|0.0   ;;  %vm222_vm0 = vmmov 0   ;;  %v223_v1 = vmov 0.0   ;;  %v42_v2 = vld [vmem:[#allocation5] sm:$0xff]  ;;  %v47_v9 = vstv %s283_s2 }
  0x26   :  { %152 = vmatprep.subr.bf16.mxu0 %v221_v0  ;;  %149 = vmatprep.mubr.msk.f32.mxu0 %vm222_vm0, %v223_v1  ;;  %v43_v3 = vld [vmem:[#allocation5 + $0x8] sm:$0xff]  ;;  %v44_v4 = vld [vmem:[#allocation5 + $0x10] sm:$0xff]  ;;  %v45_v6 = vld [vmem:[#allocation5 + $0x18] sm:$0xff]  ;;  %vm48_vm1 = vcmask 261120   ;;  %vm127_vm2 = vcmask 7168  }
  0x27   :  { %v153_v5 = vpack.c.bf16 %v43_v3, %v42_v2  ;;  %v156_v7 = vpack.c.bf16 %v45_v6, %v44_v4  ;;  %v41_v8 = vld [vmem:[#allocation3] sm:$0xff] }
  0x29   :  { %154 = vmatpush3.bf16.msra.mxu0 %v153_v5 }
  0x2a   :  { %155 = vmatprep.subr.bf16.mxu0 %v221_v0 }
  0x2d   :  { %157 = vmatpush3.bf16.msra.mxu0 %v156_v7 }
  0x30   :  { %150 = vmatmul.mubr.msk.f32.vlgmr.msra.gmra.mrb[0].mxu0 %vm48_vm1, %v41_v8 }
 0x103   :  { %v118_v10 = vpop.f32.mrb[0].mxu0 }
 0x104   :  { %v119_v11 = vadd.f32 %v118_v10, %v47_v9  ;;  %v151_v12 = vpop.f32.mrb[1].mxu0 }
 0x106   :  { %v122_v13 = vsub.f32 0.0, %v119_v11 }
 0x108   :  { %v123_v14 = vmul.f32 1.442695, %v122_v13 }
 0x10a   :  { %165 = vpow2.f32 %v123_v14 }
 0x114   :  { %v166_v15 = vpop.eup %165 }
 0x115   :  { %v125_v16 = vadd.f32 1.0, %v166_v15 }
 0x117   :  { %167 = vrcp.f32 %v125_v16 }
 0x121   :  { %v168_v17 = vpop.eup %167 }
 0x122   :  { %128 = vst.msk [vmem:[%s284_s3] sm:$0xff] %vm127_vm2, %v168_v17 }
 0x123   :  { %133 = vsyncpa [#allocation4], 1 }
 0x124   :  { %134 = vsyncpa [#allocation6], 1 }

</bundles_post_ra>
